<compile_context>
chip_gen: v5e
topology: v5e:2x2
jax: 0.10.0
libtpu: 0.0.40
codegen_flags: <defaults>
</compile_context>

<pallas_src>
import functools
import math

import jax
import jax.numpy as jnp
from jax import lax
from jax.experimental import pallas as pl
from jax.experimental.pallas import tpu as pltpu


def _round_up(x, m):
    return (x + m - 1) // m * m


# ---------------------------------------------------------------------------
# Tile-size selection (per matmul call).
# ---------------------------------------------------------------------------
def _pick_m(M):
    """Row (sublane) tiling: single tile for small M, 256-row tiles otherwise."""
    if M >= 512:
        tm = 256
    else:
        tm = _round_up(max(M, 16), 16)
    return _round_up(M, tm), tm


def _pick_n(N):
    """Output-column (lane) tiling: lane-dense 128/256-wide tiles."""
    if N > 256:
        return _round_up(N, 256), 256
    np_ = _round_up(N, 128)
    return np_, np_


def _pick_k(K):
    """K (reduction) tiling: one fat step when K<=1024, else <=1024-wide tiles."""
    kp = _round_up(K, 128)           # lane granularity of the X tile
    q = kp // 128
    if q <= 8:                       # single K step
        return kp, kp
    d = max(d for d in range(1, 9) if q % d == 0)
    return kp, 128 * d


# ---------------------------------------------------------------------------
# Fused Pallas kernel:
#   out = relu?( (X @ W_folded) + bias (+ residual) )
# bf16 MXU inputs, f32 accumulator in VMEM scratch, f32 epilogue.
# ---------------------------------------------------------------------------
def _fused_kernel(x_ref, w_ref, bias_ref, *rest, relu, has_residual):
    if has_residual:
        res_ref, o_ref, acc_ref = rest
    else:
        o_ref, acc_ref = rest
        res_ref = None

    k = pl.program_id(2)

    @pl.when(k == 0)
    def _():
        acc_ref[...] = jnp.zeros_like(acc_ref)

    acc_ref[...] += jnp.dot(x_ref[...], w_ref[...],
                            preferred_element_type=jnp.float32)

    @pl.when(k == pl.num_programs(2) - 1)
    def _():
        y = acc_ref[...] + bias_ref[...]          # f32 epilogue (v5e-safe)
        if has_residual:
            y = y + res_ref[...]
        if relu:
            y = jnp.maximum(y, 0.0)
        o_ref[...] = y.astype(o_ref.dtype)


def fused_matmul(x_mat, w_pad, bias_pad, geom, residual=None, relu=False):
    """(M,K)@(K,N) with pre-folded BN bias, optional residual add and ReLU."""
    M, K = x_mat.shape
    N, Kp, tk, Np, TN = geom["N"], geom["Kp"], geom["tk"], geom["Np"], geom["TN"]
    assert K == geom["K"]
    Mp, TM = _pick_m(M)

    xp = jnp.pad(x_mat, ((0, Mp - M), (0, Kp - K))).astype(jnp.bfloat16)

    has_res = residual is not None
    args = [xp, w_pad, bias_pad]
    in_specs = [
        pl.BlockSpec((TM, tk), lambda i, j, k: (i, k)),
        pl.BlockSpec((tk, TN), lambda i, j, k: (k, j)),
        pl.BlockSpec((1, TN), lambda i, j, k: (0, j)),
    ]
    if has_res:
        rp = jnp.pad(residual.astype(jnp.float32), ((0, Mp - M), (0, Np - N)))
        args.append(rp)
        in_specs.append(pl.BlockSpec((TM, TN), lambda i, j, k: (i, j)))

    # Per-call VMEM budget (2-deep bf16 operand tiles, f32 acc / 2-deep out),
    # clamped so it also fits v7x's 64 MiB physical / 32 MiB default scope.
    vmem_bytes = (2 * (TM * tk + tk * TN) * 2        # x / w tiles (bf16)
                  + TM * TN * 4                      # f32 accumulator
                  + 2 * TM * TN * 4                  # f32 output
                  + (2 * TM * TN * 4 if has_res else 0)
                  + 2 * 2 * TN * 4)                  # bias
    vmem_limit = min(max(2 * vmem_bytes, 8 * 1024 * 1024), 32 * 1024 * 1024)

    out = pl.pallas_call(
        functools.partial(_fused_kernel, relu=relu, has_residual=has_res),
        out_shape=jax.ShapeDtypeStruct((Mp, Np), jnp.float32),
        grid_spec=pltpu.PrefetchScalarGridSpec(
            num_scalar_prefetch=0,
            grid=(Mp // TM, Np // TN, Kp // tk),
            in_specs=in_specs,
            out_specs=pl.BlockSpec((TM, TN), lambda i, j, k: (i, j)),
            scratch_shapes=[pltpu.VMEM((TM, TN), jnp.float32)],
        ),
        compiler_params=pltpu.CompilerParams(
            dimension_semantics=("parallel", "parallel", "arbitrary"),
            vmem_limit_bytes=vmem_limit),
    )(*args)
    return out[:M, :N]


# ---------------------------------------------------------------------------
# Glue: im2col patch extraction (NHWC) and conv+BN(+res)+act wrapper.
# ---------------------------------------------------------------------------
def _im2col(x, kh, kw, stride, pad):
    n, h, w, c = x.shape
    xp = jnp.pad(x, ((0, 0), (pad, pad), (pad, pad), (0, 0)))
    hout = (h + 2 * pad - kh) // stride + 1
    wout = (w + 2 * pad - kw) // stride + 1
    cols = []
    for dh in range(kh):
        for dw in range(kw):
            cols.append(xp[:, dh:dh + stride * hout:stride,
                           dw:dw + stride * wout:stride, :])
    patches = jnp.concatenate(cols, axis=-1)          # (N, Ho, Wo, kh*kw*C)
    return patches.reshape(n * hout * wout, kh * kw * c), hout, wout


def prepare_conv_bn(conv_w, bn, stride, pad, eps=1e-5):
    """Fold BN into the conv weight/bias; pre-transpose / pad / cast ONCE."""
    cout, cin, kh, kw = conv_w.shape
    K, N = kh * kw * cin, cout
    Kp, tk = _pick_k(K)
    Np, TN = _pick_n(N)
    scale = bn["gamma"] / jnp.sqrt(bn["var"] + eps)
    bias = bn["beta"] - bn["mean"] * scale
    w_mat = jnp.transpose(conv_w, (2, 3, 1, 0)).reshape(K, N) * scale[None, :]
    w_pad = jnp.pad(w_mat, ((0, Kp - K), (0, Np - N))).astype(jnp.bfloat16)
    b_pad = jnp.pad(bias[None, :], ((0, 0), (0, Np - N))).astype(jnp.float32)
    return dict(w=w_pad, bias=b_pad, kh=kh, kw=kw, stride=stride, pad=pad,
                K=K, N=N, Kp=Kp, tk=tk, Np=Np, TN=TN)


def conv_bn_act(prep, x, relu, residual=None):
    n = x.shape[0]
    patches, hout, wout = _im2col(x, prep["kh"], prep["kw"],
                                  prep["stride"], prep["pad"])
    res_mat = None if residual is None else residual.reshape(-1, prep["N"])
    out = fused_matmul(patches, prep["w"], prep["bias"], prep,
                       residual=res_mat, relu=relu)
    return out.reshape(n, hout, wout, prep["N"])


# ---------------------------------------------------------------------------
# Deterministic parameter initialization + BasicBlock forward.
# ---------------------------------------------------------------------------
class KeyGen:
    def __init__(self, key):
        self.key = key
        self.i = 0

    def __call__(self):
        self.i += 1
        return jax.random.fold_in(self.key, self.i)


def _conv_init(key, cout, cin, kh, kw):
    fan_in = cin * kh * kw
    return jax.random.normal(key, (cout, cin, kh, kw),
                             jnp.float32) * math.sqrt(2.0 / fan_in)


def _bn_init(kg, c):
    return dict(
        gamma=1.0 + 0.1 * jax.random.normal(kg(), (c,), jnp.float32),
        beta=0.1 * jax.random.normal(kg(), (c,), jnp.float32),
        mean=0.1 * jax.random.normal(kg(), (c,), jnp.float32),
        var=1.0 + 0.1 * jax.random.uniform(kg(), (c,), jnp.float32),
    )


def init_basic_block(key, in_planes, planes, stride):
    kg = KeyGen(key)
    p = dict(
        conv1=_conv_init(kg(), planes, in_planes, 3, 3),
        bn1=_bn_init(kg, planes),
        conv2=_conv_init(kg(), planes, planes, 3, 3),
        bn2=_bn_init(kg, planes),
        stride=stride,
    )
    if stride != 1 or in_planes != planes:            # BasicBlock.expansion == 1
        p["sc_conv"] = _conv_init(kg(), planes, in_planes, 1, 1)
        p["sc_bn"] = _bn_init(kg, planes)
    return p


def prepare_basic_block(p):
    prep = dict(
        conv1=prepare_conv_bn(p["conv1"], p["bn1"], p["stride"], 1),
        conv2=prepare_conv_bn(p["conv2"], p["bn2"], 1, 1),
    )
    if "sc_conv" in p:
        prep["shortcut"] = prepare_conv_bn(p["sc_conv"], p["sc_bn"],
                                           p["stride"], 0)
    return prep


def basic_block_forward(prep, x):
    """x: NHWC.  relu(bn1(conv1 x)); bn2(conv2 .) + shortcut(x); relu."""
    out = conv_bn_act(prep["conv1"], x, relu=True)
    if "shortcut" in prep:
        sc = conv_bn_act(prep["shortcut"], x, relu=False)
    else:
        sc = x
    # conv2 + bn2 + residual add + final relu fused into one kernel call
    return conv_bn_act(prep["conv2"], out, relu=True, residual=sc)


# ---------------------------------------------------------------------------
# Pure-JAX f32 reference (for correctness check only).
# ---------------------------------------------------------------------------
def _ref_conv_bn(x, conv_w, bn, stride, pad, eps=1e-5):
    w = jnp.transpose(conv_w, (2, 3, 1, 0))           # HWIO
    y = lax.conv_general_dilated(
        x, w, window_strides=(stride, stride),
        padding=((pad, pad), (pad, pad)),
        dimension_numbers=("NHWC", "HWIO", "NHWC"))
    scale = bn["gamma"] / jnp.sqrt(bn["var"] + eps)
    return y * scale + (bn["beta"] - bn["mean"] * scale)


def _ref_basic_block(p, x):
    out = jnp.maximum(_ref_conv_bn(x, p["conv1"], p["bn1"], p["stride"], 1), 0.)
    out = _ref_conv_bn(out, p["conv2"], p["bn2"], 1, 1)
    if "sc_conv" in p:
        sc = _ref_conv_bn(x, p["sc_conv"], p["sc_bn"], p["stride"], 0)
    else:
        sc = x
    return jnp.maximum(out + sc, 0.)


if __name__ == "__main__":
    key = jax.random.PRNGKey(0)
    k1, k2, kx = jax.random.split(key, 3)

    # block 1: 4 -> 8 channels, stride 2 (projection shortcut path)
    # block 2: 8 -> 8 channels, stride 1 (identity shortcut path)
    blk1_raw = init_basic_block(k1, in_planes=4, planes=8, stride=2)
    blk2_raw = init_basic_block(k2, in_planes=8, planes=8, stride=1)
    blk1 = prepare_basic_block(blk1_raw)   # weight-side prep done once, eagerly
    blk2 = prepare_basic_block(blk2_raw)

    # example input in PyTorch NCHW convention
    x_nchw = jax.random.normal(kx, (2, 4, 16, 16), jnp.float32)

    @jax.jit
    def forward(x):
        h = jnp.transpose(x, (0, 2, 3, 1))            # NCHW -> NHWC
        h = basic_block_forward(blk1, h)
        h = basic_block_forward(blk2, h)
        return jnp.transpose(h, (0, 3, 1, 2))         # NHWC -> NCHW

    out = jax.block_until_ready(forward(x_nchw))
    assert out.shape == (2, 8, 8, 8)

    # correctness check against the pure-JAX f32 reference (bf16 MXU -> loose tol)
    x_nhwc = jnp.transpose(x_nchw, (0, 2, 3, 1))
    ref = _ref_basic_block(blk2_raw, _ref_basic_block(blk1_raw, x_nhwc))
    ref = jnp.transpose(ref, (0, 3, 1, 2))
    err = float(jnp.max(jnp.abs(out - ref)))
    tol = 5e-2 + 2e-2 * float(jnp.max(jnp.abs(ref)))
    assert err < tol, f"mismatch: max|diff|={err} tol={tol}"

    print("KERNEL_OK")
</pallas_src>

<mosaic_0001>
module attributes {stable_mosaic.version = 11 : i64} {
  func.func @_fused_kernel(%arg0: i32, %arg1: i32, %arg2: i32, %arg3: memref<128x128xbf16, #tpu.memory_space<vmem>>, %arg4: memref<128x128xbf16, #tpu.memory_space<vmem>>, %arg5: memref<1x128xf32, #tpu.memory_space<vmem>>, %arg6: memref<128x128xf32, #tpu.memory_space<vmem>>, %arg7: memref<128x128xf32, #tpu.memory_space<vmem>>) attributes {dimension_semantics = [#tpu.dimension_semantics<parallel>, #tpu.dimension_semantics<parallel>, #tpu.dimension_semantics<arbitrary>], iteration_bounds = array<i64: 1, 1, 1>, scalar_prefetch = 0 : i64, scratch_operands = 1 : i64, tpu.core_type = #tpu.core_type<tc>, window_params = [{transform_indices = @transform_0, window_bounds = array<i64: 128, 128>}, {transform_indices = @transform_1, window_bounds = array<i64: 128, 128>}, {transform_indices = @transform_2, window_bounds = array<i64: 1, 128>}, {transform_indices = @transform_3, window_bounds = array<i64: 128, 128>}]} {
    %c0_i32 = arith.constant 0 : i32
    %0 = arith.cmpi eq, %arg2, %c0_i32 : i32
    %1 = arith.extui %0 : i1 to i32
    %c0_i32_0 = arith.constant 0 : i32
    %2 = arith.cmpi ne, %1, %c0_i32_0 : i32
    scf.if %2 {
      %cst_10 = arith.constant 0.000000e+00 : f32
      %12 = vector.broadcast %cst_10 : f32 to vector<128x128xf32>
      %c0_11 = arith.constant 0 : index
      %c0_12 = arith.constant 0 : index
      %13 = vector.load %arg7[%c0_11, %c0_12] : memref<128x128xf32, #tpu.memory_space<vmem>>, vector<128x128xf32>
      tpu.vector_store %arg7[%c0_11, %c0_12], %12 {strides = array<i32>} : memref<128x128xf32, #tpu.memory_space<vmem>>, vector<128x128xf32>,
    } else {
    }
    %c0 = arith.constant 0 : index
    %c0_1 = arith.constant 0 : index
    %3 = vector.load %arg7[%c0, %c0_1] : memref<128x128xf32, #tpu.memory_space<vmem>>, vector<128x128xf32>
    %c0_2 = arith.constant 0 : index
    %c0_3 = arith.constant 0 : index
    %4 = vector.load %arg3[%c0_2, %c0_3] : memref<128x128xbf16, #tpu.memory_space<vmem>>, vector<128x128xbf16>
    %c0_4 = arith.constant 0 : index
    %c0_5 = arith.constant 0 : index
    %5 = vector.load %arg4[%c0_4, %c0_5] : memref<128x128xbf16, #tpu.memory_space<vmem>>, vector<128x128xbf16>
    %cst = arith.constant dense<0.000000e+00> : vector<128x128xf32>
    %6 = tpu.matmul %4, %5, %cst {dimension_numbers = #tpu.dot_dimension_numbers<[1], [0], [0], [1], [0, 0, 1, 1], [], []>} : vector<128x128xbf16>, vector<128x128xbf16>, vector<128x128xf32> -> vector<128x128xf32>
    %7 = arith.addf %3, %6 : vector<128x128xf32>
    %c0_6 = arith.constant 0 : index
    %c0_7 = arith.constant 0 : index
    %8 = vector.load %arg7[%c0_6, %c0_7] : memref<128x128xf32, #tpu.memory_space<vmem>>, vector<128x128xf32>
    tpu.vector_store %arg7[%c0_6, %c0_7], %7 {strides = array<i32>} : memref<128x128xf32, #tpu.memory_space<vmem>>, vector<128x128xf32>,
    %c0_i32_8 = arith.constant 0 : i32
    %9 = arith.cmpi eq, %arg2, %c0_i32_8 : i32
    %10 = arith.extui %9 : i1 to i32
    %c0_i32_9 = arith.constant 0 : i32
    %11 = arith.cmpi ne, %10, %c0_i32_9 : i32
    scf.if %11 {
      %c0_10 = arith.constant 0 : index
      %c0_11 = arith.constant 0 : index
      %12 = vector.load %arg7[%c0_10, %c0_11] : memref<128x128xf32, #tpu.memory_space<vmem>>, vector<128x128xf32>
      %c0_12 = arith.constant 0 : index
      %c0_13 = arith.constant 0 : index
      %13 = vector.load %arg5[%c0_12, %c0_13] : memref<1x128xf32, #tpu.memory_space<vmem>>, vector<1x128xf32>
      %14 = vector.broadcast %13 : vector<1x128xf32> to vector<128x128xf32>
      %15 = arith.addf %12, %14 : vector<128x128xf32>
      %c0_14 = arith.constant 0 : index
      %c0_15 = arith.constant 0 : index
      %16 = vector.load %arg6[%c0_14, %c0_15] : memref<128x128xf32, #tpu.memory_space<vmem>>, vector<128x128xf32>
      tpu.vector_store %arg6[%c0_14, %c0_15], %15 {strides = array<i32>} : memref<128x128xf32, #tpu.memory_space<vmem>>, vector<128x128xf32>,
    } else {
    }
    return
  }
  func.func @transform_0(%arg0: i32, %arg1: i32, %arg2: i32) -> (i32, i32) {
    %c0_i32 = arith.constant 0 : i32
    return %arg0, %arg2 : i32, i32
  }
  func.func @transform_1(%arg0: i32, %arg1: i32, %arg2: i32) -> (i32, i32) {
    %c0_i32 = arith.constant 0 : i32
    return %arg2, %arg1 : i32, i32
  }
  func.func @transform_2(%arg0: i32, %arg1: i32, %arg2: i32) -> (i32, i32) {
    %c0_i32 = arith.constant 0 : i32
    %c0_i32_0 = arith.constant 0 : i32
    return %c0_i32, %arg1 : i32, i32
  }
  func.func @transform_3(%arg0: i32, %arg1: i32, %arg2: i32) -> (i32, i32) {
    %c0_i32 = arith.constant 0 : i32
    return %arg0, %arg1 : i32, i32
  }
}

module attributes {stable_mosaic.version = 11 : i64} {
  func.func @_fused_kernel(%arg0: i32, %arg1: i32, %arg2: i32, %arg3: memref<128x128xbf16, #tpu.memory_space<vmem>>, %arg4: memref<128x128xbf16, #tpu.memory_space<vmem>>, %arg5: memref<1x128xf32, #tpu.memory_space<vmem>>, %arg6: memref<128x128xf32, #tpu.memory_space<vmem>>, %arg7: memref<128x128xf32, #tpu.memory_space<vmem>>) attributes {dimension_semantics = [#tpu.dimension_semantics<parallel>, #tpu.dimension_semantics<parallel>, #tpu.dimension_semantics<arbitrary>], iteration_bounds = array<i64: 1, 1, 1>, scalar_prefetch = 0 : i64, scratch_operands = 1 : i64, tpu.core_type = #tpu.core_type<tc>, window_params = [{transform_indices = @transform_0, window_bounds = array<i64: 128, 128>}, {transform_indices = @transform_1, window_bounds = array<i64: 128, 128>}, {transform_indices = @transform_2, window_bounds = array<i64: 1, 128>}, {transform_indices = @transform_3, window_bounds = array<i64: 128, 128>}]} {
    %c0_i32 = arith.constant 0 : i32
    %0 = arith.cmpi eq, %arg2, %c0_i32 : i32
    %1 = arith.extui %0 : i1 to i32
    %c0_i32_0 = arith.constant 0 : i32
    %2 = arith.cmpi ne, %1, %c0_i32_0 : i32
    scf.if %2 {
      %cst_10 = arith.constant 0.000000e+00 : f32
      %12 = vector.broadcast %cst_10 : f32 to vector<128x128xf32>
      %c0_11 = arith.constant 0 : index
      %c0_12 = arith.constant 0 : index
      %13 = vector.load %arg7[%c0_11, %c0_12] : memref<128x128xf32, #tpu.memory_space<vmem>>, vector<128x128xf32>
      tpu.vector_store %arg7[%c0_11, %c0_12], %12 {strides = array<i32>} : memref<128x128xf32, #tpu.memory_space<vmem>>, vector<128x128xf32>,
    } else {
    }
    %c0 = arith.constant 0 : index
    %c0_1 = arith.constant 0 : index
    %3 = vector.load %arg7[%c0, %c0_1] : memref<128x128xf32, #tpu.memory_space<vmem>>, vector<128x128xf32>
    %c0_2 = arith.constant 0 : index
    %c0_3 = arith.constant 0 : index
    %4 = vector.load %arg3[%c0_2, %c0_3] : memref<128x128xbf16, #tpu.memory_space<vmem>>, vector<128x128xbf16>
    %c0_4 = arith.constant 0 : index
    %c0_5 = arith.constant 0 : index
    %5 = vector.load %arg4[%c0_4, %c0_5] : memref<128x128xbf16, #tpu.memory_space<vmem>>, vector<128x128xbf16>
    %cst = arith.constant dense<0.000000e+00> : vector<128x128xf32>
    %6 = tpu.matmul %4, %5, %cst {dimension_numbers = #tpu.dot_dimension_numbers<[1], [0], [0], [1], [0, 0, 1, 1], [], []>} : vector<128x128xbf16>, vector<128x128xbf16>, vector<128x128xf32> -> vector<128x128xf32>
    %7 = arith.addf %3, %6 : vector<128x128xf32>
    %c0_6 = arith.constant 0 : index
    %c0_7 = arith.constant 0 : index
    %8 = vector.load %arg7[%c0_6, %c0_7] : memref<128x128xf32, #tpu.memory_space<vmem>>, vector<128x128xf32>
    tpu.vector_store %arg7[%c0_6, %c0_7], %7 {strides = array<i32>} : memref<128x128xf32, #tpu.memory_space<vmem>>, vector<128x128xf32>,
    %c0_i32_8 = arith.constant 0 : i32
    %9 = arith.cmpi eq, %arg2, %c0_i32_8 : i32
    %10 = arith.extui %9 : i1 to i32
    %c0_i32_9 = arith.constant 0 : i32
    %11 = arith.cmpi ne, %10, %c0_i32_9 : i32
    scf.if %11 {
      %c0_10 = arith.constant 0 : index
      %c0_11 = arith.constant 0 : index
      %12 = vector.load %arg7[%c0_10, %c0_11] : memref<128x128xf32, #tpu.memory_space<vmem>>, vector<128x128xf32>
      %c0_12 = arith.constant 0 : index
      %c0_13 = arith.constant 0 : index
      %13 = vector.load %arg5[%c0_12, %c0_13] : memref<1x128xf32, #tpu.memory_space<vmem>>, vector<1x128xf32>
      %14 = vector.broadcast %13 : vector<1x128xf32> to vector<128x128xf32>
      %15 = arith.addf %12, %14 : vector<128x128xf32>
      %cst_14 = arith.constant 0.000000e+00 : f32
      %16 = vector.broadcast %cst_14 : f32 to vector<128x128xf32>
      %17 = arith.maximumf %15, %16 : vector<128x128xf32>
      %c0_15 = arith.constant 0 : index
      %c0_16 = arith.constant 0 : index
      %18 = vector.load %arg6[%c0_15, %c0_16] : memref<128x128xf32, #tpu.memory_space<vmem>>, vector<128x128xf32>
      tpu.vector_store %arg6[%c0_15, %c0_16], %17 {strides = array<i32>} : memref<128x128xf32, #tpu.memory_space<vmem>>, vector<128x128xf32>,
    } else {
    }
    return
  }
  func.func @transform_0(%arg0: i32, %arg1: i32, %arg2: i32) -> (i32, i32) {
    %c0_i32 = arith.constant 0 : i32
    return %arg0, %arg2 : i32, i32
  }
  func.func @transform_1(%arg0: i32, %arg1: i32, %arg2: i32) -> (i32, i32) {
    %c0_i32 = arith.constant 0 : i32
    return %arg2, %arg1 : i32, i32
  }
  func.func @transform_2(%arg0: i32, %arg1: i32, %arg2: i32) -> (i32, i32) {
    %c0_i32 = arith.constant 0 : i32
    %c0_i32_0 = arith.constant 0 : i32
    return %c0_i32, %arg1 : i32, i32
  }
  func.func @transform_3(%arg0: i32, %arg1: i32, %arg2: i32) -> (i32, i32) {
    %c0_i32 = arith.constant 0 : i32
    return %arg0, %arg1 : i32, i32
  }
}

module attributes {stable_mosaic.version = 11 : i64} {
  func.func @_fused_kernel(%arg0: i32, %arg1: i32, %arg2: i32, %arg3: memref<128x128xbf16, #tpu.memory_space<vmem>>, %arg4: memref<128x128xbf16, #tpu.memory_space<vmem>>, %arg5: memref<1x128xf32, #tpu.memory_space<vmem>>, %arg6: memref<128x128xf32, #tpu.memory_space<vmem>>, %arg7: memref<128x128xf32, #tpu.memory_space<vmem>>, %arg8: memref<128x128xf32, #tpu.memory_space<vmem>>) attributes {dimension_semantics = [#tpu.dimension_semantics<parallel>, #tpu.dimension_semantics<parallel>, #tpu.dimension_semantics<arbitrary>], iteration_bounds = array<i64: 1, 1, 1>, scalar_prefetch = 0 : i64, scratch_operands = 1 : i64, tpu.core_type = #tpu.core_type<tc>, window_params = [{transform_indices = @transform_0, window_bounds = array<i64: 128, 128>}, {transform_indices = @transform_1, window_bounds = array<i64: 128, 128>}, {transform_indices = @transform_2, window_bounds = array<i64: 1, 128>}, {transform_indices = @transform_3, window_bounds = array<i64: 128, 128>}, {transform_indices = @transform_4, window_bounds = array<i64: 128, 128>}]} {
    %c0_i32 = arith.constant 0 : i32
    %0 = arith.cmpi eq, %arg2, %c0_i32 : i32
    %1 = arith.extui %0 : i1 to i32
    %c0_i32_0 = arith.constant 0 : i32
    %2 = arith.cmpi ne, %1, %c0_i32_0 : i32
    scf.if %2 {
      %cst_10 = arith.constant 0.000000e+00 : f32
      %12 = vector.broadcast %cst_10 : f32 to vector<128x128xf32>
      %c0_11 = arith.constant 0 : index
      %c0_12 = arith.constant 0 : index
      %13 = vector.load %arg8[%c0_11, %c0_12] : memref<128x128xf32, #tpu.memory_space<vmem>>, vector<128x128xf32>
      tpu.vector_store %arg8[%c0_11, %c0_12], %12 {strides = array<i32>} : memref<128x128xf32, #tpu.memory_space<vmem>>, vector<128x128xf32>,
    } else {
    }
    %c0 = arith.constant 0 : index
    %c0_1 = arith.constant 0 : index
    %3 = vector.load %arg8[%c0, %c0_1] : memref<128x128xf32, #tpu.memory_space<vmem>>, vector<128x128xf32>
    %c0_2 = arith.constant 0 : index
    %c0_3 = arith.constant 0 : index
    %4 = vector.load %arg3[%c0_2, %c0_3] : memref<128x128xbf16, #tpu.memory_space<vmem>>, vector<128x128xbf16>
    %c0_4 = arith.constant 0 : index
    %c0_5 = arith.constant 0 : index
    %5 = vector.load %arg4[%c0_4, %c0_5] : memref<128x128xbf16, #tpu.memory_space<vmem>>, vector<128x128xbf16>
    %cst = arith.constant dense<0.000000e+00> : vector<128x128xf32>
    %6 = tpu.matmul %4, %5, %cst {dimension_numbers = #tpu.dot_dimension_numbers<[1], [0], [0], [1], [0, 0, 1, 1], [], []>} : vector<128x128xbf16>, vector<128x128xbf16>, vector<128x128xf32> -> vector<128x128xf32>
    %7 = arith.addf %3, %6 : vector<128x128xf32>
    %c0_6 = arith.constant 0 : index
    %c0_7 = arith.constant 0 : index
    %8 = vector.load %arg8[%c0_6, %c0_7] : memref<128x128xf32, #tpu.memory_space<vmem>>, vector<128x128xf32>
    tpu.vector_store %arg8[%c0_6, %c0_7], %7 {strides = array<i32>} : memref<128x128xf32, #tpu.memory_space<vmem>>, vector<128x128xf32>,
    %c0_i32_8 = arith.constant 0 : i32
    %9 = arith.cmpi eq, %arg2, %c0_i32_8 : i32
    %10 = arith.extui %9 : i1 to i32
    %c0_i32_9 = arith.constant 0 : i32
    %11 = arith.cmpi ne, %10, %c0_i32_9 : i32
    scf.if %11 {
      %c0_10 = arith.constant 0 : index
      %c0_11 = arith.constant 0 : index
      %12 = vector.load %arg8[%c0_10, %c0_11] : memref<128x128xf32, #tpu.memory_space<vmem>>, vector<128x128xf32>
      %c0_12 = arith.constant 0 : index
      %c0_13 = arith.constant 0 : index
      %13 = vector.load %arg5[%c0_12, %c0_13] : memref<1x128xf32, #tpu.memory_space<vmem>>, vector<1x128xf32>
      %14 = vector.broadcast %13 : vector<1x128xf32> to vector<128x128xf32>
      %15 = arith.addf %12, %14 : vector<128x128xf32>
      %c0_14 = arith.constant 0 : index
      %c0_15 = arith.constant 0 : index
      %16 = vector.load %arg6[%c0_14, %c0_15] : memref<128x128xf32, #tpu.memory_space<vmem>>, vector<128x128xf32>
      %17 = arith.addf %15, %16 : vector<128x128xf32>
      %cst_16 = arith.constant 0.000000e+00 : f32
      %18 = vector.broadcast %cst_16 : f32 to vector<128x128xf32>
      %19 = arith.maximumf %17, %18 : vector<128x128xf32>
      %c0_17 = arith.constant 0 : index
      %c0_18 = arith.constant 0 : index
      %20 = vector.load %arg7[%c0_17, %c0_18] : memref<128x128xf32, #tpu.memory_space<vmem>>, vector<128x128xf32>
      tpu.vector_store %arg7[%c0_17, %c0_18], %19 {strides = array<i32>} : memref<128x128xf32, #tpu.memory_space<vmem>>, vector<128x128xf32>,
    } else {
    }
    return
  }
  func.func @transform_0(%arg0: i32, %arg1: i32, %arg2: i32) -> (i32, i32) {
    %c0_i32 = arith.constant 0 : i32
    return %arg0, %arg2 : i32, i32
  }
  func.func @transform_1(%arg0: i32, %arg1: i32, %arg2: i32) -> (i32, i32) {
    %c0_i32 = arith.constant 0 : i32
    return %arg2, %arg1 : i32, i32
  }
  func.func @transform_2(%arg0: i32, %arg1: i32, %arg2: i32) -> (i32, i32) {
    %c0_i32 = arith.constant 0 : i32
    %c0_i32_0 = arith.constant 0 : i32
    return %c0_i32, %arg1 : i32, i32
  }
  func.func @transform_3(%arg0: i32, %arg1: i32, %arg2: i32) -> (i32, i32) {
    %c0_i32 = arith.constant 0 : i32
    return %arg0, %arg1 : i32, i32
  }
  func.func @transform_4(%arg0: i32, %arg1: i32, %arg2: i32) -> (i32, i32) {
    %c0_i32 = arith.constant 0 : i32
    return %arg0, %arg1 : i32, i32
  }
}

</mosaic_0001>

<bundles_post_ra>
// kernel: forward.6
= control target key start
LH: loop header
LB: loop body
LE: loop exit
PB: predicated region body
PF: predicated region fallthrough
CT: control target
= control target key end

     0   :  { %s542_s1 = inlined_call_operand.vmem [shape: bf16[128,128], index: 1, kind: input, shape index: {}]   ;;  %s543_s2 = inlined_call_operand.vmem [shape: f32[1,128], index: 2, kind: input, shape index: {}]   ;;  %s544_s0 = inlined_call_operand.vmem [shape: bf16[128,128], index: 0, kind: input, shape index: {}]   ;;  %s545_s3 = inlined_call_operand.vmem [shape: f32[128,128], index: 3, kind: output, shape index: {}]  }
   0x1   :  { %v397_v0 = vld [vmem:[%s542_s1 + $0x38] sm:$0xff]  ;;  %v396_v1 = vld [vmem:[%s542_s1 + $0x30] sm:$0xff]  ;;  %v395_v2 = vld [vmem:[%s542_s1 + $0x28] sm:$0xff] }
   0x2   :  { %178 = vmatpush.bf16.msra.mxu0 %v397_v0  ;;  %398 = vmatpush.bf16.msra.mxu1 %v397_v0  ;;  %v394_v3 = vld [vmem:[%s542_s1 + $0x20] sm:$0xff]  ;;  %v393_v4 = vld [vmem:[%s542_s1 + $0x18] sm:$0xff]  ;;  %v392_v5 = vld [vmem:[%s542_s1 + $0x10] sm:$0xff] }
   0x3   :  { %399 = vmatpush.bf16.msra.mxu2 %v397_v0  ;;  %400 = vmatpush.bf16.msra.mxu3 %v397_v0  ;;  %v391_v6 = vld [vmem:[%s542_s1 + $0x8] sm:$0xff]  ;;  %v390_v7 = vld [vmem:[%s542_s1] sm:$0xff]  ;;  %v384_v9 = vld [vmem:[%s544_s0 + $0x10] sm:$0xff] }
   0x4   :  { %v382_v8 = vld [vmem:[%s544_s0] sm:$0xff]  ;;  %v388_v11 = vld [vmem:[%s544_s0 + $0x30] sm:$0xff]  ;;  %v383_v12 = vld [vmem:[%s544_s0 + $0x8] sm:$0xff] }
   0x5   :  { %v386_v10 = vld [vmem:[%s544_s0 + $0x20] sm:$0xff]  ;;  %v385_v13 = vld [vmem:[%s544_s0 + $0x18] sm:$0xff]  ;;  %v387_v14 = vld [vmem:[%s544_s0 + $0x28] sm:$0xff] }
   0x6   :  { %179 = vmatpush.bf16.msra.mxu0 %v396_v1  ;;  %401 = vmatpush.bf16.msra.mxu1 %v396_v1  ;;  %v389_v15 = vld [vmem:[%s544_s0 + $0x38] sm:$0xff]  ;;  %v422_v16 = vld [vmem:[%s543_s2] ss:$0 sm:$0xff] }
   0x7   :  { %402 = vmatpush.bf16.msra.mxu2 %v396_v1  ;;  %403 = vmatpush.bf16.msra.mxu3 %v396_v1 }
   0xa   :  { %180 = vmatpush.bf16.msra.mxu0 %v395_v2  ;;  %404 = vmatpush.bf16.msra.mxu1 %v395_v2 }
   0xb   :  { %405 = vmatpush.bf16.msra.mxu2 %v395_v2  ;;  %406 = vmatpush.bf16.msra.mxu3 %v395_v2 }
   0xe   :  { %181 = vmatpush.bf16.msra.mxu0 %v394_v3  ;;  %407 = vmatpush.bf16.msra.mxu1 %v394_v3 }
   0xf   :  { %408 = vmatpush.bf16.msra.mxu2 %v394_v3  ;;  %409 = vmatpush.bf16.msra.mxu3 %v394_v3 }
  0x12   :  { %182 = vmatpush.bf16.msra.mxu0 %v393_v4  ;;  %410 = vmatpush.bf16.msra.mxu1 %v393_v4 }
  0x13   :  { %411 = vmatpush.bf16.msra.mxu2 %v393_v4  ;;  %412 = vmatpush.bf16.msra.mxu3 %v393_v4 }
  0x16   :  { %183 = vmatpush.bf16.msra.mxu0 %v392_v5  ;;  %413 = vmatpush.bf16.msra.mxu1 %v392_v5 }
  0x17   :  { %414 = vmatpush.bf16.msra.mxu2 %v392_v5  ;;  %415 = vmatpush.bf16.msra.mxu3 %v392_v5 }
  0x1a   :  { %184 = vmatpush.bf16.msra.mxu0 %v391_v6  ;;  %416 = vmatpush.bf16.msra.mxu1 %v391_v6 }
  0x1b   :  { %417 = vmatpush.bf16.msra.mxu2 %v391_v6  ;;  %418 = vmatpush.bf16.msra.mxu3 %v391_v6 }
  0x1e   :  { %185 = vmatpush.bf16.msra.mxu0 %v390_v7  ;;  %419 = vmatpush.bf16.msra.mxu1 %v390_v7 }
  0x1f   :  { %420 = vmatpush.bf16.msra.mxu2 %v390_v7  ;;  %421 = vmatpush.bf16.msra.mxu3 %v390_v7 }
  0x21   :  { %186 = vmatmul.bf16.vlgmr.msra.gmra.mxu0 %v382_v8  ;;  %196 = vmatmul.bf16.vlgmr.msra.gmra.mxu1 %v384_v9 }
  0x22   :  { %206 = vmatmul.bf16.vlgmr.msra.gmra.mxu2 %v386_v10  ;;  %216 = vmatmul.bf16.vlgmr.msra.gmra.mxu3 %v388_v11 }
  0x31   :  { %191 = vmatmul.bf16.gmra.mxu0 %v383_v12  ;;  %201 = vmatmul.bf16.gmra.mxu1 %v385_v13 }
  0x32   :  { %211 = vmatmul.bf16.gmra.mxu2 %v387_v14  ;;  %221 = vmatmul.bf16.gmra.mxu3 %v389_v15 }
  0x9e   :  { %v187_v17 = vpop.f32.mrf.mxu0  ;;  %v197_v18 = vpop.f32.mrf.mxu1 }
  0x9f   :  { %v282_v19 = vadd.f32 %v422_v16, %v187_v17  ;;  %v286_v20 = vadd.f32 %v422_v16, %v197_v18 }
  0xa1   :  { %298 = vst [vmem:[%s545_s3] sm:$0xff] %v282_v19 }
  0xa2   :  { %302 = vst [vmem:[%s545_s3 + $0x20] sm:$0xff] %v286_v20 }
  0xa5   :  { %v207_v21 = vpop.f32.mrf.mxu2  ;;  %v217_v22 = vpop.f32.mrf.mxu3 }
  0xa6   :  { %v290_v23 = vadd.f32 %v422_v16, %v207_v21  ;;  %v294_v24 = vadd.f32 %v422_v16, %v217_v22  ;;  %v189_v25 = vpop.f32.mrf.mxu0  ;;  %v199_v26 = vpop.f32.mrf.mxu1 }
  0xa7   :  { %v283_v27 = vadd.f32 %v422_v16, %v189_v25  ;;  %v287_v28 = vadd.f32 %v422_v16, %v199_v26 }
  0xa8   :  { %306 = vst [vmem:[%s545_s3 + $0x40] sm:$0xff] %v290_v23 }
  0xa9   :  { %310 = vst [vmem:[%s545_s3 + $0x60] sm:$0xff] %v294_v24 }
  0xaa   :  { %299 = vst [vmem:[%s545_s3 + $0x8] sm:$0xff] %v283_v27 }
  0xab   :  { %303 = vst [vmem:[%s545_s3 + $0x28] sm:$0xff] %v287_v28 }
  0xad   :  { %v209_v29 = vpop.f32.mrf.mxu2  ;;  %v219_v30 = vpop.f32.mrf.mxu3 }
  0xae   :  { %v291_v31 = vadd.f32 %v422_v16, %v209_v29  ;;  %v295_v32 = vadd.f32 %v422_v16, %v219_v30  ;;  %v192_v33 = vpop.f32.mrf.mxu0  ;;  %v202_v34 = vpop.f32.mrf.mxu1 }
  0xaf   :  { %v284_v35 = vadd.f32 %v422_v16, %v192_v33  ;;  %v288_v36 = vadd.f32 %v422_v16, %v202_v34 }
  0xb0   :  { %307 = vst [vmem:[%s545_s3 + $0x48] sm:$0xff] %v291_v31 }
  0xb1   :  { %311 = vst [vmem:[%s545_s3 + $0x68] sm:$0xff] %v295_v32 }
  0xb2   :  { %300 = vst [vmem:[%s545_s3 + $0x10] sm:$0xff] %v284_v35 }
  0xb3   :  { %304 = vst [vmem:[%s545_s3 + $0x30] sm:$0xff] %v288_v36 }
  0xb5   :  { %v212_v37 = vpop.f32.mrf.mxu2  ;;  %v222_v38 = vpop.f32.mrf.mxu3 }
  0xb6   :  { %v292_v39 = vadd.f32 %v422_v16, %v212_v37  ;;  %v296_v40 = vadd.f32 %v422_v16, %v222_v38  ;;  %v194_v41 = vpop.f32.mrf.mxu0  ;;  %v204_v42 = vpop.f32.mrf.mxu1 }
  0xb7   :  { %v285_v43 = vadd.f32 %v422_v16, %v194_v41  ;;  %v289_v44 = vadd.f32 %v422_v16, %v204_v42 }
  0xb8   :  { %308 = vst [vmem:[%s545_s3 + $0x50] sm:$0xff] %v292_v39 }
  0xb9   :  { %312 = vst [vmem:[%s545_s3 + $0x70] sm:$0xff] %v296_v40 }
  0xba   :  { %301 = vst [vmem:[%s545_s3 + $0x18] sm:$0xff] %v285_v43 }
  0xbb   :  { %305 = vst [vmem:[%s545_s3 + $0x38] sm:$0xff] %v289_v44 }
  0xbd   :  { %v214_v45 = vpop.f32.mrf.mxu2  ;;  %v224_v46 = vpop.f32.mrf.mxu3 }
  0xbe   :  { %v293_v47 = vadd.f32 %v422_v16, %v214_v45  ;;  %v297_v48 = vadd.f32 %v422_v16, %v224_v46 }
  0xc0   :  { %309 = vst [vmem:[%s545_s3 + $0x58] sm:$0xff] %v293_v47 }
  0xc1   :  { %313 = vst [vmem:[%s545_s3 + $0x78] sm:$0xff] %v297_v48 }

// kernel: forward.5
= control target key start
LH: loop header
LB: loop body
LE: loop exit
PB: predicated region body
PF: predicated region fallthrough
CT: control target
= control target key end

     0   :  { %s558_s1 = inlined_call_operand.vmem [shape: bf16[128,128], index: 1, kind: input, shape index: {}]   ;;  %s559_s2 = inlined_call_operand.vmem [shape: f32[1,128], index: 2, kind: input, shape index: {}]   ;;  %s560_s0 = inlined_call_operand.vmem [shape: bf16[128,128], index: 0, kind: input, shape index: {}]   ;;  %s561_s3 = inlined_call_operand.vmem [shape: f32[128,128], index: 3, kind: output, shape index: {}]  }
   0x1   :  { %v413_v0 = vld [vmem:[%s558_s1 + $0x38] sm:$0xff]  ;;  %v412_v1 = vld [vmem:[%s558_s1 + $0x30] sm:$0xff]  ;;  %v411_v2 = vld [vmem:[%s558_s1 + $0x28] sm:$0xff] }
   0x2   :  { %178 = vmatpush.bf16.msra.mxu0 %v413_v0  ;;  %414 = vmatpush.bf16.msra.mxu1 %v413_v0  ;;  %v410_v3 = vld [vmem:[%s558_s1 + $0x20] sm:$0xff]  ;;  %v409_v4 = vld [vmem:[%s558_s1 + $0x18] sm:$0xff]  ;;  %v408_v5 = vld [vmem:[%s558_s1 + $0x10] sm:$0xff] }
   0x3   :  { %415 = vmatpush.bf16.msra.mxu2 %v413_v0  ;;  %416 = vmatpush.bf16.msra.mxu3 %v413_v0  ;;  %v407_v6 = vld [vmem:[%s558_s1 + $0x8] sm:$0xff]  ;;  %v406_v7 = vld [vmem:[%s558_s1] sm:$0xff]  ;;  %v400_v9 = vld [vmem:[%s560_s0 + $0x10] sm:$0xff] }
   0x4   :  { %v398_v8 = vld [vmem:[%s560_s0] sm:$0xff]  ;;  %v404_v11 = vld [vmem:[%s560_s0 + $0x30] sm:$0xff]  ;;  %v399_v12 = vld [vmem:[%s560_s0 + $0x8] sm:$0xff] }
   0x5   :  { %v402_v10 = vld [vmem:[%s560_s0 + $0x20] sm:$0xff]  ;;  %v401_v13 = vld [vmem:[%s560_s0 + $0x18] sm:$0xff]  ;;  %v403_v14 = vld [vmem:[%s560_s0 + $0x28] sm:$0xff] }
   0x6   :  { %179 = vmatpush.bf16.msra.mxu0 %v412_v1  ;;  %417 = vmatpush.bf16.msra.mxu1 %v412_v1  ;;  %v405_v15 = vld [vmem:[%s560_s0 + $0x38] sm:$0xff]  ;;  %v438_v16 = vld [vmem:[%s559_s2] ss:$0 sm:$0xff] }
   0x7   :  { %418 = vmatpush.bf16.msra.mxu2 %v412_v1  ;;  %419 = vmatpush.bf16.msra.mxu3 %v412_v1 }
   0xa   :  { %180 = vmatpush.bf16.msra.mxu0 %v411_v2  ;;  %420 = vmatpush.bf16.msra.mxu1 %v411_v2 }
   0xb   :  { %421 = vmatpush.bf16.msra.mxu2 %v411_v2  ;;  %422 = vmatpush.bf16.msra.mxu3 %v411_v2 }
   0xe   :  { %181 = vmatpush.bf16.msra.mxu0 %v410_v3  ;;  %423 = vmatpush.bf16.msra.mxu1 %v410_v3 }
   0xf   :  { %424 = vmatpush.bf16.msra.mxu2 %v410_v3  ;;  %425 = vmatpush.bf16.msra.mxu3 %v410_v3 }
  0x12   :  { %182 = vmatpush.bf16.msra.mxu0 %v409_v4  ;;  %426 = vmatpush.bf16.msra.mxu1 %v409_v4 }
  0x13   :  { %427 = vmatpush.bf16.msra.mxu2 %v409_v4  ;;  %428 = vmatpush.bf16.msra.mxu3 %v409_v4 }
  0x16   :  { %183 = vmatpush.bf16.msra.mxu0 %v408_v5  ;;  %429 = vmatpush.bf16.msra.mxu1 %v408_v5 }
  0x17   :  { %430 = vmatpush.bf16.msra.mxu2 %v408_v5  ;;  %431 = vmatpush.bf16.msra.mxu3 %v408_v5 }
  0x1a   :  { %184 = vmatpush.bf16.msra.mxu0 %v407_v6  ;;  %432 = vmatpush.bf16.msra.mxu1 %v407_v6 }
  0x1b   :  { %433 = vmatpush.bf16.msra.mxu2 %v407_v6  ;;  %434 = vmatpush.bf16.msra.mxu3 %v407_v6 }
  0x1e   :  { %185 = vmatpush.bf16.msra.mxu0 %v406_v7  ;;  %435 = vmatpush.bf16.msra.mxu1 %v406_v7 }
  0x1f   :  { %436 = vmatpush.bf16.msra.mxu2 %v406_v7  ;;  %437 = vmatpush.bf16.msra.mxu3 %v406_v7 }
  0x21   :  { %186 = vmatmul.bf16.vlgmr.msra.gmra.mxu0 %v398_v8  ;;  %196 = vmatmul.bf16.vlgmr.msra.gmra.mxu1 %v400_v9 }
  0x22   :  { %206 = vmatmul.bf16.vlgmr.msra.gmra.mxu2 %v402_v10  ;;  %216 = vmatmul.bf16.vlgmr.msra.gmra.mxu3 %v404_v11 }
  0x31   :  { %191 = vmatmul.bf16.gmra.mxu0 %v399_v12  ;;  %201 = vmatmul.bf16.gmra.mxu1 %v401_v13 }
  0x32   :  { %211 = vmatmul.bf16.gmra.mxu2 %v403_v14  ;;  %221 = vmatmul.bf16.gmra.mxu3 %v405_v15 }
  0x9e   :  { %v187_v17 = vpop.f32.mrf.mxu0  ;;  %v197_v18 = vpop.f32.mrf.mxu1 }
  0x9f   :  { %v282_v19 = vadd.f32 %v438_v16, %v187_v17  ;;  %v286_v20 = vadd.f32 %v438_v16, %v197_v18 }
  0xa1   :  { %v298_v21 = vmax.f32 %v282_v19, 0.0  ;;  %v302_v22 = vmax.f32 %v286_v20, 0.0 }
  0xa3   :  { %314 = vst [vmem:[%s561_s3] sm:$0xff] %v298_v21 }
  0xa4   :  { %318 = vst [vmem:[%s561_s3 + $0x20] sm:$0xff] %v302_v22 }
  0xa5   :  { %v207_v23 = vpop.f32.mrf.mxu2  ;;  %v217_v24 = vpop.f32.mrf.mxu3 }
  0xa6   :  { %v290_v25 = vadd.f32 %v438_v16, %v207_v23  ;;  %v294_v26 = vadd.f32 %v438_v16, %v217_v24  ;;  %v189_v27 = vpop.f32.mrf.mxu0  ;;  %v199_v28 = vpop.f32.mrf.mxu1 }
  0xa7   :  { %v283_v29 = vadd.f32 %v438_v16, %v189_v27  ;;  %v287_v30 = vadd.f32 %v438_v16, %v199_v28 }
  0xa8   :  { %v306_v31 = vmax.f32 %v290_v25, 0.0  ;;  %v310_v32 = vmax.f32 %v294_v26, 0.0 }
  0xa9   :  { %v299_v33 = vmax.f32 %v283_v29, 0.0  ;;  %v303_v34 = vmax.f32 %v287_v30, 0.0 }
  0xaa   :  { %322 = vst [vmem:[%s561_s3 + $0x40] sm:$0xff] %v306_v31 }
  0xab   :  { %326 = vst [vmem:[%s561_s3 + $0x60] sm:$0xff] %v310_v32 }
  0xac   :  { %315 = vst [vmem:[%s561_s3 + $0x8] sm:$0xff] %v299_v33 }
  0xad   :  { %319 = vst [vmem:[%s561_s3 + $0x28] sm:$0xff] %v303_v34  ;;  %v209_v35 = vpop.f32.mrf.mxu2  ;;  %v219_v36 = vpop.f32.mrf.mxu3 }
  0xae   :  { %v291_v37 = vadd.f32 %v438_v16, %v209_v35  ;;  %v295_v38 = vadd.f32 %v438_v16, %v219_v36  ;;  %v192_v39 = vpop.f32.mrf.mxu0  ;;  %v202_v40 = vpop.f32.mrf.mxu1 }
  0xaf   :  { %v284_v41 = vadd.f32 %v438_v16, %v192_v39  ;;  %v288_v42 = vadd.f32 %v438_v16, %v202_v40 }
  0xb0   :  { %v307_v43 = vmax.f32 %v291_v37, 0.0  ;;  %v311_v44 = vmax.f32 %v295_v38, 0.0 }
  0xb1   :  { %v300_v45 = vmax.f32 %v284_v41, 0.0  ;;  %v304_v46 = vmax.f32 %v288_v42, 0.0 }
  0xb2   :  { %323 = vst [vmem:[%s561_s3 + $0x48] sm:$0xff] %v307_v43 }
  0xb3   :  { %327 = vst [vmem:[%s561_s3 + $0x68] sm:$0xff] %v311_v44 }
  0xb4   :  { %316 = vst [vmem:[%s561_s3 + $0x10] sm:$0xff] %v300_v45 }
  0xb5   :  { %320 = vst [vmem:[%s561_s3 + $0x30] sm:$0xff] %v304_v46  ;;  %v212_v47 = vpop.f32.mrf.mxu2  ;;  %v222_v48 = vpop.f32.mrf.mxu3 }
  0xb6   :  { %v292_v49 = vadd.f32 %v438_v16, %v212_v47  ;;  %v296_v50 = vadd.f32 %v438_v16, %v222_v48  ;;  %v194_v51 = vpop.f32.mrf.mxu0  ;;  %v204_v52 = vpop.f32.mrf.mxu1 }
  0xb7   :  { %v285_v53 = vadd.f32 %v438_v16, %v194_v51  ;;  %v289_v54 = vadd.f32 %v438_v16, %v204_v52 }
  0xb8   :  { %v308_v55 = vmax.f32 %v292_v49, 0.0  ;;  %v312_v56 = vmax.f32 %v296_v50, 0.0 }
  0xb9   :  { %v301_v57 = vmax.f32 %v285_v53, 0.0  ;;  %v305_v58 = vmax.f32 %v289_v54, 0.0 }
  0xba   :  { %324 = vst [vmem:[%s561_s3 + $0x50] sm:$0xff] %v308_v55 }
  0xbb   :  { %328 = vst [vmem:[%s561_s3 + $0x70] sm:$0xff] %v312_v56 }
  0xbc   :  { %317 = vst [vmem:[%s561_s3 + $0x18] sm:$0xff] %v301_v57 }
  0xbd   :  { %321 = vst [vmem:[%s561_s3 + $0x38] sm:$0xff] %v305_v58  ;;  %v214_v59 = vpop.f32.mrf.mxu2  ;;  %v224_v60 = vpop.f32.mrf.mxu3 }
  0xbe   :  { %v293_v61 = vadd.f32 %v438_v16, %v214_v59  ;;  %v297_v62 = vadd.f32 %v438_v16, %v224_v60 }
  0xc0   :  { %v309_v63 = vmax.f32 %v293_v61, 0.0  ;;  %v313_v0 = vmax.f32 %v297_v62, 0.0 }
  0xc2   :  { %325 = vst [vmem:[%s561_s3 + $0x58] sm:$0xff] %v309_v63 }
  0xc3   :  { %329 = vst [vmem:[%s561_s3 + $0x78] sm:$0xff] %v313_v0 }

// kernel: forward.7
= control target key start
LH: loop header
LB: loop body
LE: loop exit
PB: predicated region body
PF: predicated region fallthrough
CT: control target
= control target key end

     0   :  { %s664_s1 = inlined_call_operand.vmem [shape: bf16[128,128], index: 1, kind: input, shape index: {}]   ;;  %s665_s2 = inlined_call_operand.vmem [shape: f32[1,128], index: 2, kind: input, shape index: {}]   ;;  %s666_s0 = inlined_call_operand.vmem [shape: bf16[128,128], index: 0, kind: input, shape index: {}]   ;;  %s667_s3 = inlined_call_operand.vmem [shape: f32[128,128], index: 3, kind: input, shape index: {}]   ;;  %s668_s4 = inlined_call_operand.vmem [shape: f32[128,128], index: 4, kind: output, shape index: {}]  }
   0x1   :  { %v448_v0 = vld [vmem:[%s664_s1 + $0x38] sm:$0xff]  ;;  %v447_v1 = vld [vmem:[%s664_s1 + $0x30] sm:$0xff]  ;;  %v446_v2 = vld [vmem:[%s664_s1 + $0x28] sm:$0xff] }
   0x2   :  { %181 = vmatpush.bf16.msra.mxu0 %v448_v0  ;;  %449 = vmatpush.bf16.msra.mxu1 %v448_v0  ;;  %v445_v3 = vld [vmem:[%s664_s1 + $0x20] sm:$0xff]  ;;  %v444_v4 = vld [vmem:[%s664_s1 + $0x18] sm:$0xff]  ;;  %v443_v5 = vld [vmem:[%s664_s1 + $0x10] sm:$0xff] }
   0x3   :  { %450 = vmatpush.bf16.msra.mxu2 %v448_v0  ;;  %451 = vmatpush.bf16.msra.mxu3 %v448_v0  ;;  %v442_v6 = vld [vmem:[%s664_s1 + $0x8] sm:$0xff]  ;;  %v441_v7 = vld [vmem:[%s664_s1] sm:$0xff]  ;;  %v435_v9 = vld [vmem:[%s666_s0 + $0x10] sm:$0xff] }
   0x4   :  { %v433_v8 = vld [vmem:[%s666_s0] sm:$0xff]  ;;  %v439_v11 = vld [vmem:[%s666_s0 + $0x30] sm:$0xff]  ;;  %v434_v12 = vld [vmem:[%s666_s0 + $0x8] sm:$0xff] }
   0x5   :  { %v437_v10 = vld [vmem:[%s666_s0 + $0x20] sm:$0xff]  ;;  %v436_v13 = vld [vmem:[%s666_s0 + $0x18] sm:$0xff]  ;;  %v438_v14 = vld [vmem:[%s666_s0 + $0x28] sm:$0xff] }
   0x6   :  { %182 = vmatpush.bf16.msra.mxu0 %v447_v1  ;;  %452 = vmatpush.bf16.msra.mxu1 %v447_v1  ;;  %v440_v15 = vld [vmem:[%s666_s0 + $0x38] sm:$0xff]  ;;  %v550_v16 = vld [vmem:[%s665_s2] ss:$0 sm:$0xff]  ;;  %v302_v34 = vld [vmem:[%s667_s3 + $0x8] sm:$0xff] }
   0x7   :  { %453 = vmatpush.bf16.msra.mxu2 %v447_v1  ;;  %454 = vmatpush.bf16.msra.mxu3 %v447_v1  ;;  %v301_v18 = vld [vmem:[%s667_s3] sm:$0xff]  ;;  %v306_v36 = vld [vmem:[%s667_s3 + $0x28] sm:$0xff]  ;;  %v303_v54 = vld [vmem:[%s667_s3 + $0x10] sm:$0xff] }
   0x8   :  { %v305_v20 = vld [vmem:[%s667_s3 + $0x20] sm:$0xff]  ;;  %v310_v48 = vld [vmem:[%s667_s3 + $0x48] sm:$0xff]  ;;  %v307_v56 = vld [vmem:[%s667_s3 + $0x30] sm:$0xff] }
   0x9   :  { %v309_v28 = vld [vmem:[%s667_s3 + $0x40] sm:$0xff]  ;;  %v314_v50 = vld [vmem:[%s667_s3 + $0x68] sm:$0xff] }
   0xa   :  { %183 = vmatpush.bf16.msra.mxu0 %v446_v2  ;;  %455 = vmatpush.bf16.msra.mxu1 %v446_v2  ;;  %v313_v30 = vld [vmem:[%s667_s3 + $0x60] sm:$0xff] }
   0xb   :  { %456 = vmatpush.bf16.msra.mxu2 %v446_v2  ;;  %457 = vmatpush.bf16.msra.mxu3 %v446_v2 }
   0xe   :  { %184 = vmatpush.bf16.msra.mxu0 %v445_v3  ;;  %458 = vmatpush.bf16.msra.mxu1 %v445_v3 }
   0xf   :  { %459 = vmatpush.bf16.msra.mxu2 %v445_v3  ;;  %460 = vmatpush.bf16.msra.mxu3 %v445_v3 }
  0x12   :  { %185 = vmatpush.bf16.msra.mxu0 %v444_v4  ;;  %461 = vmatpush.bf16.msra.mxu1 %v444_v4 }
  0x13   :  { %462 = vmatpush.bf16.msra.mxu2 %v444_v4  ;;  %463 = vmatpush.bf16.msra.mxu3 %v444_v4  ;;  %v311_v4 = vld [vmem:[%s667_s3 + $0x50] sm:$0xff] }
  0x16   :  { %186 = vmatpush.bf16.msra.mxu0 %v443_v5  ;;  %464 = vmatpush.bf16.msra.mxu1 %v443_v5 }
  0x17   :  { %465 = vmatpush.bf16.msra.mxu2 %v443_v5  ;;  %466 = vmatpush.bf16.msra.mxu3 %v443_v5 }
  0x1a   :  { %187 = vmatpush.bf16.msra.mxu0 %v442_v6  ;;  %467 = vmatpush.bf16.msra.mxu1 %v442_v6 }
  0x1b   :  { %468 = vmatpush.bf16.msra.mxu2 %v442_v6  ;;  %469 = vmatpush.bf16.msra.mxu3 %v442_v6  ;;  %v315_v6 = vld [vmem:[%s667_s3 + $0x70] sm:$0xff] }
  0x1e   :  { %188 = vmatpush.bf16.msra.mxu0 %v441_v7  ;;  %470 = vmatpush.bf16.msra.mxu1 %v441_v7 }
  0x1f   :  { %471 = vmatpush.bf16.msra.mxu2 %v441_v7  ;;  %472 = vmatpush.bf16.msra.mxu3 %v441_v7 }
  0x21   :  { %189 = vmatmul.bf16.vlgmr.msra.gmra.mxu0 %v433_v8  ;;  %199 = vmatmul.bf16.vlgmr.msra.gmra.mxu1 %v435_v9 }
  0x22   :  { %209 = vmatmul.bf16.vlgmr.msra.gmra.mxu2 %v437_v10  ;;  %219 = vmatmul.bf16.vlgmr.msra.gmra.mxu3 %v439_v11  ;;  %v304_v10 = vld [vmem:[%s667_s3 + $0x18] sm:$0xff] }
  0x31   :  { %194 = vmatmul.bf16.gmra.mxu0 %v434_v12  ;;  %204 = vmatmul.bf16.gmra.mxu1 %v436_v13  ;;  %v308_v12 = vld [vmem:[%s667_s3 + $0x38] sm:$0xff] }
  0x32   :  { %214 = vmatmul.bf16.gmra.mxu2 %v438_v14  ;;  %224 = vmatmul.bf16.gmra.mxu3 %v440_v15 }
  0x9e   :  { %v190_v17 = vpop.f32.mrf.mxu0  ;;  %v200_v19 = vpop.f32.mrf.mxu1 }
  0x9f   :  { %v285_v21 = vadd.f32 %v550_v16, %v190_v17  ;;  %v289_v22 = vadd.f32 %v550_v16, %v200_v19 }
  0xa1   :  { %v317_v23 = vadd.f32 %v301_v18, %v285_v21  ;;  %v321_v24 = vadd.f32 %v305_v20, %v289_v22 }
  0xa3   :  { %v333_v25 = vmax.f32 %v317_v23, 0.0  ;;  %v337_v26 = vmax.f32 %v321_v24, 0.0 }
  0xa5   :  { %349 = vst [vmem:[%s668_s4] sm:$0xff] %v333_v25  ;;  %v210_v27 = vpop.f32.mrf.mxu2  ;;  %v220_v29 = vpop.f32.mrf.mxu3  ;;  %v312_v25 = vld [vmem:[%s667_s3 + $0x58] sm:$0xff] }
  0xa6   :  { %353 = vst [vmem:[%s668_s4 + $0x20] sm:$0xff] %v337_v26  ;;  %v293_v31 = vadd.f32 %v550_v16, %v210_v27  ;;  %v297_v32 = vadd.f32 %v550_v16, %v220_v29  ;;  %v192_v33 = vpop.f32.mrf.mxu0  ;;  %v202_v35 = vpop.f32.mrf.mxu1  ;;  %v316_v27 = vld [vmem:[%s667_s3 + $0x78] sm:$0xff] }
  0xa7   :  { %v286_v37 = vadd.f32 %v550_v16, %v192_v33  ;;  %v290_v38 = vadd.f32 %v550_v16, %v202_v35 }
  0xa8   :  { %v325_v39 = vadd.f32 %v309_v28, %v293_v31  ;;  %v329_v40 = vadd.f32 %v313_v30, %v297_v32 }
  0xa9   :  { %v318_v41 = vadd.f32 %v302_v34, %v286_v37  ;;  %v322_v42 = vadd.f32 %v306_v36, %v290_v38 }
  0xaa   :  { %v341_v43 = vmax.f32 %v325_v39, 0.0  ;;  %v345_v44 = vmax.f32 %v329_v40, 0.0 }
  0xab   :  { %v334_v45 = vmax.f32 %v318_v41, 0.0  ;;  %v338_v46 = vmax.f32 %v322_v42, 0.0 }
  0xac   :  { %357 = vst [vmem:[%s668_s4 + $0x40] sm:$0xff] %v341_v43 }
  0xad   :  { %361 = vst [vmem:[%s668_s4 + $0x60] sm:$0xff] %v345_v44  ;;  %v212_v47 = vpop.f32.mrf.mxu2  ;;  %v222_v49 = vpop.f32.mrf.mxu3 }
  0xae   :  { %350 = vst [vmem:[%s668_s4 + $0x8] sm:$0xff] %v334_v45  ;;  %v294_v51 = vadd.f32 %v550_v16, %v212_v47  ;;  %v298_v52 = vadd.f32 %v550_v16, %v222_v49  ;;  %v195_v53 = vpop.f32.mrf.mxu0  ;;  %v205_v55 = vpop.f32.mrf.mxu1 }
  0xaf   :  { %354 = vst [vmem:[%s668_s4 + $0x28] sm:$0xff] %v338_v46  ;;  %v287_v57 = vadd.f32 %v550_v16, %v195_v53  ;;  %v291_v58 = vadd.f32 %v550_v16, %v205_v55 }
  0xb0   :  { %v326_v59 = vadd.f32 %v310_v48, %v294_v51  ;;  %v330_v60 = vadd.f32 %v314_v50, %v298_v52 }
  0xb1   :  { %v319_v61 = vadd.f32 %v303_v54, %v287_v57  ;;  %v323_v62 = vadd.f32 %v307_v56, %v291_v58 }
  0xb2   :  { %v342_v63 = vmax.f32 %v326_v59, 0.0  ;;  %v346_v0 = vmax.f32 %v330_v60, 0.0 }
  0xb3   :  { %v335_v1 = vmax.f32 %v319_v61, 0.0  ;;  %v339_v2 = vmax.f32 %v323_v62, 0.0 }
  0xb4   :  { %358 = vst [vmem:[%s668_s4 + $0x48] sm:$0xff] %v342_v63 }
  0xb5   :  { %362 = vst [vmem:[%s668_s4 + $0x68] sm:$0xff] %v346_v0  ;;  %v215_v3 = vpop.f32.mrf.mxu2  ;;  %v225_v5 = vpop.f32.mrf.mxu3 }
  0xb6   :  { %351 = vst [vmem:[%s668_s4 + $0x10] sm:$0xff] %v335_v1  ;;  %v295_v7 = vadd.f32 %v550_v16, %v215_v3  ;;  %v299_v8 = vadd.f32 %v550_v16, %v225_v5  ;;  %v197_v9 = vpop.f32.mrf.mxu0  ;;  %v207_v11 = vpop.f32.mrf.mxu1 }
  0xb7   :  { %355 = vst [vmem:[%s668_s4 + $0x30] sm:$0xff] %v339_v2  ;;  %v288_v13 = vadd.f32 %v550_v16, %v197_v9  ;;  %v292_v14 = vadd.f32 %v550_v16, %v207_v11 }
  0xb8   :  { %v327_v15 = vadd.f32 %v311_v4, %v295_v7  ;;  %v331_v17 = vadd.f32 %v315_v6, %v299_v8 }
  0xb9   :  { %v320_v18 = vadd.f32 %v304_v10, %v288_v13  ;;  %v324_v19 = vadd.f32 %v308_v12, %v292_v14 }
  0xba   :  { %v343_v20 = vmax.f32 %v327_v15, 0.0  ;;  %v347_v21 = vmax.f32 %v331_v17, 0.0 }
  0xbb   :  { %v336_v22 = vmax.f32 %v320_v18, 0.0  ;;  %v340_v23 = vmax.f32 %v324_v19, 0.0 }
  0xbc   :  { %359 = vst [vmem:[%s668_s4 + $0x50] sm:$0xff] %v343_v20 }
  0xbd   :  { %363 = vst [vmem:[%s668_s4 + $0x70] sm:$0xff] %v347_v21  ;;  %v217_v24 = vpop.f32.mrf.mxu2  ;;  %v227_v26 = vpop.f32.mrf.mxu3 }
  0xbe   :  { %352 = vst [vmem:[%s668_s4 + $0x18] sm:$0xff] %v336_v22  ;;  %v296_v28 = vadd.f32 %v550_v16, %v217_v24  ;;  %v300_v29 = vadd.f32 %v550_v16, %v227_v26 }
  0xbf   :  { %356 = vst [vmem:[%s668_s4 + $0x38] sm:$0xff] %v340_v23 }
  0xc0   :  { %v328_v30 = vadd.f32 %v312_v25, %v296_v28  ;;  %v332_v31 = vadd.f32 %v316_v27, %v300_v29 }
  0xc2   :  { %v344_v32 = vmax.f32 %v328_v30, 0.0  ;;  %v348_v33 = vmax.f32 %v332_v31, 0.0 }
  0xc4   :  { %360 = vst [vmem:[%s668_s4 + $0x58] sm:$0xff] %v344_v32 }
  0xc5   :  { %364 = vst [vmem:[%s668_s4 + $0x78] sm:$0xff] %v348_v33 }

</bundles_post_ra>
